<compile_context>
chip_gen: v7x
topology: tpu7x:2x2x1
jax: 0.10.0
libtpu: 0.0.40
codegen_flags: <defaults>
</compile_context>

<pallas_src>
import jax
import jax.numpy as jnp
from jax.experimental import pallas as pl
from jax.experimental.pallas import tpu as pltpu


OUT_FEATURES = 10          # 'output' Linear width
TB_MAX = 2048              # max batch-tile rows per grid step


# ---------------------------------------------------------------------------
# Pallas kernel: folded MLP  (x @ W_A + b_A) -> ReLU -> (@ W_B + b_B)
# One grid step = one batch tile; weights/biases stay VMEM-resident
# (constant index_map -> no re-DMA across grid steps).
# ---------------------------------------------------------------------------
def mlp_kernel(x_ref, wa_ref, ba_ref, wb_ref, bb_ref, o_ref):
    x = x_ref[...]                                                    # (TB, 256)
    h = jnp.dot(x, wa_ref[...], preferred_element_type=jnp.float32) + ba_ref[...]
    h = jnp.maximum(h, 0.0)                                           # ReLU0
    h = jnp.dot(h, wb_ref[...], preferred_element_type=jnp.float32) + bb_ref[...]
    o_ref[...] = h.astype(o_ref.dtype)                                # (TB, 10)


# ---------------------------------------------------------------------------
# One-time algebraic folding of adjacent Linear layers (no nonlinearity
# between them).  Call once at parameter-init time, NOT per forward.
#   'input' (256->64) . 'Linear0' (64->32)  ->  W_A (256,32), b_A (1,32)
#   'Linear1' (32->32) . 'output' (32->10)  ->  W_B (32,10),  b_B (1,10)
# ---------------------------------------------------------------------------
def fold_params(params):
    (w_in, b_in), (w_h0, b_h0), (w_h1, b_h1), (w_out, b_out) = params
    w_A = w_in @ w_h0
    b_A = b_in @ w_h0 + b_h0
    w_B = w_h1 @ w_out
    b_B = b_h1 @ w_out + b_out
    return w_A, b_A, w_B, b_B


def _round_up(a, m):
    return ((a + m - 1) // m) * m


# ---------------------------------------------------------------------------
# Wrapper: flatten (NCHW -> (B, C*H*W)), grid over batch, narrow (B,10) out.
# Takes pre-folded params (see fold_params).
# ---------------------------------------------------------------------------
def neural_network_forward(x_nchw, folded_params):
    w_A, b_A, w_B, b_B = folded_params

    B = x_nchw.shape[0]
    x_flat = x_nchw.reshape(B, -1).astype(jnp.float32)                # nn.Flatten
    in_features = x_flat.shape[1]                                     # 256

    # --- batch tiling: cap padding waste, keep >=2 tiles for v7x megacore ---
    n_tiles = pl.cdiv(B, TB_MAX)
    if B >= 16:
        n_tiles = max(n_tiles, 2)            # feed both v7x TensorCores
    TB = _round_up(pl.cdiv(B, n_tiles), 8)   # >= 8 sublanes
    B_pad = n_tiles * TB
    if B_pad != B:
        x_flat = jnp.pad(x_flat, ((0, B_pad - B), (0, 0)))

    grid_spec = pltpu.PrefetchScalarGridSpec(
        num_scalar_prefetch=0,
        grid=(n_tiles,),
        in_specs=[
            pl.BlockSpec((TB, in_features), lambda i: (i, 0)),        # x: streamed
            pl.BlockSpec(w_A.shape, lambda i: (0, 0)),                # weights: resident
            pl.BlockSpec(b_A.shape, lambda i: (0, 0)),
            pl.BlockSpec(w_B.shape, lambda i: (0, 0)),
            pl.BlockSpec(b_B.shape, lambda i: (0, 0)),
        ],
        # Last block dim (10) equals the full array dim -> legal; avoids the
        # 128-lane padded output + separate slice pass.
        out_specs=pl.BlockSpec((TB, OUT_FEATURES), lambda i: (i, 0)),
    )

    out = pl.pallas_call(
        mlp_kernel,
        out_shape=jax.ShapeDtypeStruct((B_pad, OUT_FEATURES), jnp.float32),
        grid_spec=grid_spec,
        compiler_params=pltpu.CompilerParams(
            dimension_semantics=("parallel",),        # v7x: shard batch grid across 2 TCs
            vmem_limit_bytes=32 * 1024 * 1024,        # headroom; TB=2048 footprint ~6 MB
        ),
    )(x_flat, w_A, b_A, w_B, b_B)

    return out if B_pad == B else out[:B]


# ---------------------------------------------------------------------------
# Deterministic parameter init (mimics torch.nn.Linear default: U(-k, k),
# k = 1/sqrt(in_features)).  Weights stored pre-transposed as (in, out).
# ---------------------------------------------------------------------------
def init_linear(key, in_f, out_f):
    kw, kb = jax.random.split(key)
    bound = 1.0 / (in_f ** 0.5)
    w_t = jax.random.uniform(kw, (in_f, out_f), jnp.float32, -bound, bound)
    b = jax.random.uniform(kb, (1, out_f), jnp.float32, -bound, bound)
    return w_t, b


def init_params(key):
    k0, k1, k2, k3 = jax.random.split(key, 4)
    return (
        init_linear(k0, 256, 64),   # 'input'   Linear(256, 64)
        init_linear(k1, 64, 32),    # 'Linear0' Linear(64, 32)
        init_linear(k2, 32, 32),    # 'Linear1' Linear(32, 32)
        init_linear(k3, 32, 10),    # 'output'  Linear(32, 10)
    )


# Pure-JAX layer-by-layer reference (matches the PyTorch module exactly).
def reference_forward(x_nchw, params):
    h = x_nchw.reshape(x_nchw.shape[0], -1)
    (w_in, b_in), (w_h0, b_h0), (w_h1, b_h1), (w_out, b_out) = params
    h = h @ w_in + b_in          # 'input'
    h = h @ w_h0 + b_h0          # 'Linear0'
    h = jnp.maximum(h, 0.0)      # 'ReLU0'
    h = h @ w_h1 + b_h1          # 'Linear1'
    h = h @ w_out + b_out        # 'output'
    return h


if __name__ == "__main__":
    key = jax.random.PRNGKey(0)
    k_x, k_p = jax.random.split(key)

    # NCHW input, small shapes: batch=2, channels=4, spatial=8x8 -> 256 features.
    x = jax.random.normal(k_x, (2, 4, 8, 8), dtype=jnp.float32)
    params = init_params(k_p)

    # One-time folding (hoisted out of the per-call forward).
    folded = fold_params(params)
    folded = jax.tree_util.tree_map(jax.block_until_ready, folded)

    logits = neural_network_forward(x, folded)
    logits = jax.block_until_ready(logits)

    ref = reference_forward(x, params)
    assert logits.shape == (2, OUT_FEATURES), logits.shape
    assert jnp.allclose(logits, ref, atol=1e-4, rtol=1e-4), "mismatch vs reference"

    print("KERNEL_OK")
</pallas_src>

<mosaic_0001>
module attributes {stable_mosaic.version = 11 : i64} {
  func.func @mlp_kernel(%arg0: i32, %arg1: memref<8x256xf32, #tpu.memory_space<vmem>>, %arg2: memref<256x32xf32, #tpu.memory_space<vmem>>, %arg3: memref<1x32xf32, #tpu.memory_space<vmem>>, %arg4: memref<32x10xf32, #tpu.memory_space<vmem>>, %arg5: memref<1x10xf32, #tpu.memory_space<vmem>>, %arg6: memref<8x10xf32, #tpu.memory_space<vmem>>) attributes {dimension_semantics = [#tpu.dimension_semantics<parallel>], iteration_bounds = array<i64: 1>, scalar_prefetch = 0 : i64, scratch_operands = 0 : i64, tpu.core_type = #tpu.core_type<tc>, window_params = [{transform_indices = @transform_0, window_bounds = array<i64: 8, 256>}, {pipeline_mode = #tpu.pipeline_mode<synchronous>, transform_indices = @transform_1, window_bounds = array<i64: 256, 32>}, {pipeline_mode = #tpu.pipeline_mode<synchronous>, transform_indices = @transform_2, window_bounds = array<i64: 1, 32>}, {pipeline_mode = #tpu.pipeline_mode<synchronous>, transform_indices = @transform_3, window_bounds = array<i64: 32, 10>}, {pipeline_mode = #tpu.pipeline_mode<synchronous>, transform_indices = @transform_4, window_bounds = array<i64: 1, 10>}, {transform_indices = @transform_5, window_bounds = array<i64: 8, 10>}]} {
    %c0 = arith.constant 0 : index
    %c0_0 = arith.constant 0 : index
    %0 = vector.load %arg1[%c0, %c0_0] : memref<8x256xf32, #tpu.memory_space<vmem>>, vector<8x256xf32>
    %c0_1 = arith.constant 0 : index
    %c0_2 = arith.constant 0 : index
    %1 = vector.load %arg2[%c0_1, %c0_2] : memref<256x32xf32, #tpu.memory_space<vmem>>, vector<256x32xf32>
    %cst = arith.constant dense<0.000000e+00> : vector<8x32xf32>
    %2 = tpu.matmul %0, %1, %cst {dimension_numbers = #tpu.dot_dimension_numbers<[1], [0], [0], [1], [0, 0, 1, 1], [], []>} : vector<8x256xf32>, vector<256x32xf32>, vector<8x32xf32> -> vector<8x32xf32>
    %c0_3 = arith.constant 0 : index
    %c0_4 = arith.constant 0 : index
    %3 = vector.load %arg3[%c0_3, %c0_4] : memref<1x32xf32, #tpu.memory_space<vmem>>, vector<1x32xf32>
    %4 = vector.broadcast %3 : vector<1x32xf32> to vector<8x32xf32>
    %5 = arith.addf %2, %4 : vector<8x32xf32>
    %cst_5 = arith.constant 0.000000e+00 : f32
    %6 = vector.broadcast %cst_5 : f32 to vector<8x32xf32>
    %7 = arith.maximumf %5, %6 : vector<8x32xf32>
    %c0_6 = arith.constant 0 : index
    %c0_7 = arith.constant 0 : index
    %8 = vector.load %arg4[%c0_6, %c0_7] : memref<32x10xf32, #tpu.memory_space<vmem>>, vector<32x10xf32>
    %cst_8 = arith.constant dense<0.000000e+00> : vector<8x10xf32>
    %9 = tpu.matmul %7, %8, %cst_8 {dimension_numbers = #tpu.dot_dimension_numbers<[1], [0], [0], [1], [0, 0, 1, 1], [], []>} : vector<8x32xf32>, vector<32x10xf32>, vector<8x10xf32> -> vector<8x10xf32>
    %c0_9 = arith.constant 0 : index
    %c0_10 = arith.constant 0 : index
    %10 = vector.load %arg5[%c0_9, %c0_10] : memref<1x10xf32, #tpu.memory_space<vmem>>, vector<1x10xf32>
    %11 = vector.broadcast %10 : vector<1x10xf32> to vector<8x10xf32>
    %12 = arith.addf %9, %11 : vector<8x10xf32>
    %c0_11 = arith.constant 0 : index
    %c0_12 = arith.constant 0 : index
    %13 = vector.load %arg6[%c0_11, %c0_12] : memref<8x10xf32, #tpu.memory_space<vmem>>, vector<8x10xf32>
    tpu.vector_store %arg6[%c0_11, %c0_12], %12 {strides = array<i32>} : memref<8x10xf32, #tpu.memory_space<vmem>>, vector<8x10xf32>,
    return
  }
  func.func @transform_0(%arg0: i32) -> (i32, i32) {
    %c0_i32 = arith.constant 0 : i32
    %c0_i32_0 = arith.constant 0 : i32
    return %arg0, %c0_i32 : i32, i32
  }
  func.func @transform_1(%arg0: i32) -> (i32, i32) {
    %c0_i32 = arith.constant 0 : i32
    %c0_i32_0 = arith.constant 0 : i32
    %c0_i32_1 = arith.constant 0 : i32
    return %c0_i32, %c0_i32_0 : i32, i32
  }
  func.func @transform_2(%arg0: i32) -> (i32, i32) {
    %c0_i32 = arith.constant 0 : i32
    %c0_i32_0 = arith.constant 0 : i32
    %c0_i32_1 = arith.constant 0 : i32
    return %c0_i32, %c0_i32_0 : i32, i32
  }
  func.func @transform_3(%arg0: i32) -> (i32, i32) {
    %c0_i32 = arith.constant 0 : i32
    %c0_i32_0 = arith.constant 0 : i32
    %c0_i32_1 = arith.constant 0 : i32
    return %c0_i32, %c0_i32_0 : i32, i32
  }
  func.func @transform_4(%arg0: i32) -> (i32, i32) {
    %c0_i32 = arith.constant 0 : i32
    %c0_i32_0 = arith.constant 0 : i32
    %c0_i32_1 = arith.constant 0 : i32
    return %c0_i32, %c0_i32_0 : i32, i32
  }
  func.func @transform_5(%arg0: i32) -> (i32, i32) {
    %c0_i32 = arith.constant 0 : i32
    %c0_i32_0 = arith.constant 0 : i32
    return %arg0, %c0_i32 : i32, i32
  }
}

</mosaic_0001>

<bundles_post_ra>
// kernel: tpu_custom_call.1
= control target key start
LH: loop header
LB: loop body
LE: loop exit
PB: predicated region body
PF: predicated region fallthrough
CT: control target
= control target key end

     0   :  { %s520_s0 = inlined_call_operand.vmem [shape: f32[8,256], index: 0, kind: input, shape index: {}]   ;;  %s521_s1 = inlined_call_operand.vmem [shape: f32[256,32], index: 1, kind: input, shape index: {}]   ;;  %s522_s2 = inlined_call_operand.vmem [shape: f32[1,32], index: 2, kind: input, shape index: {}]   ;;  %s523_s3 = inlined_call_operand.vmem [shape: f32[32,10], index: 3, kind: input, shape index: {}]   ;;  %s524_s4 = inlined_call_operand.vmem [shape: f32[1,10], index: 4, kind: input, shape index: {}]   ;;  %s525_s5 = inlined_call_operand.hbm [shape: f32[8,10], index: 5, kind: output, shape index: {}]  }
   0x1   :  { %v39_v0 = vld [vmem:[%s521_s1 + $0x80] sm:$0xff]  ;;  %v40_v1 = vld [vmem:[%s521_s1 + $0x88] sm:$0xff]  ;;  %v41_v5 = vld [vmem:[%s521_s1 + $0x90] sm:$0xff] }
   0x2   :  { %v23_v2 = vld [vmem:[%s521_s1] sm:$0xff]  ;;  %v288_v3 = vpack.c.bf16 %v40_v1, %v39_v0  ;;  %v24_v4 = vld [vmem:[%s521_s1 + $0x8] sm:$0xff]  ;;  %v42_v6 = vld [vmem:[%s521_s1 + $0x98] sm:$0xff] }
   0x3   :  { %v290_v7 = vpack.c.bf16 %v24_v4, %v23_v2  ;;  %v292_v8 = vpack.c.bf16 %v42_v6, %v41_v5  ;;  %v25_v9 = vld [vmem:[%s521_s1 + $0x10] sm:$0xff]  ;;  %v26_v10 = vld [vmem:[%s521_s1 + $0x18] sm:$0xff]  ;;  %v43_v11 = vld [vmem:[%s521_s1 + $0xa0] sm:$0xff] }
   0x4   :  { %289 = vmatprep.subr.bf16.mxu0 %v288_v3  ;;  %v44_v12 = vld [vmem:[%s521_s1 + $0xa8] sm:$0xff]  ;;  %v294_v13 = vpack.c.bf16 %v26_v10, %v25_v9  ;;  %v27_v15 = vld [vmem:[%s521_s1 + $0x20] sm:$0xff]  ;;  %v45_v17 = vld [vmem:[%s521_s1 + $0xb0] sm:$0xff] }
   0x5   :  { %291 = vmatpush3.bf16.msra.mxu0 %v290_v7  ;;  %v296_v14 = vpack.c.bf16 %v44_v12, %v43_v11  ;;  %v28_v16 = vld [vmem:[%s521_s1 + $0x28] sm:$0xff]  ;;  %v46_v18 = vld [vmem:[%s521_s1 + $0xb8] sm:$0xff]  ;;  %v29_v21 = vld [vmem:[%s521_s1 + $0x30] sm:$0xff] }
   0x6   :  { %293 = vmatprep.subr.bf16.mxu0 %v292_v8  ;;  %v298_v19 = vpack.c.bf16 %v28_v16, %v27_v15  ;;  %v300_v20 = vpack.c.bf16 %v46_v18, %v45_v17  ;;  %v30_v22 = vld [vmem:[%s521_s1 + $0x38] sm:$0xff]  ;;  %v47_v23 = vld [vmem:[%s521_s1 + $0xc0] sm:$0xff]  ;;  %v48_v24 = vld [vmem:[%s521_s1 + $0xc8] sm:$0xff] }
   0x7   :  { %v22_v25 = vld [vmem:[%s520_s0 + $0x8] sm:$0xff] }
   0x8   :  { %126 = vmatprep.mubr.f32.mxu0 %v22_v25 }
   0x9   :  { %295 = vmatpush3.bf16.msra.mxu0 %v294_v13 }
   0xa   :  { %297 = vmatprep.subr.bf16.mxu0 %v296_v14 }
   0xb   :  { %10 = vsyncpa [#allocation3], 0  ;;  %v302_v26 = vpack.c.bf16 %v30_v22, %v29_v21  ;;  %v304_v27 = vpack.c.bf16 %v48_v24, %v47_v23  ;;  %v31_v28 = vld [vmem:[%s521_s1 + $0x40] sm:$0xff]  ;;  %v32_v29 = vld [vmem:[%s521_s1 + $0x48] sm:$0xff]  ;;  %v354_v53 = vmov 0.0|0.0   ;;  %vm355_vm0 = vmmov 0  }
   0xc   :  { %v49_v30 = vld [vmem:[%s521_s1 + $0xd0] sm:$0xff]  ;;  %v50_v31 = vld [vmem:[%s521_s1 + $0xd8] sm:$0xff]  ;;  %v306_v32 = vpack.c.bf16 %v32_v29, %v31_v28  ;;  %v51_v36 = vld [vmem:[%s521_s1 + $0xe0] sm:$0xff]  ;;  %320 = vmatprep.subr.bf16.mxu1 %v354_v53  ;;  %v356_v57 = vmov 0.0   ;;  %vm144_vm1 = vcmask 261120   ;;  %vm218_vm2 = vcmask 80896  }
   0xd   :  { %299 = vmatpush3.bf16.msra.mxu0 %v298_v19  ;;  %v308_v33 = vpack.c.bf16 %v50_v31, %v49_v30  ;;  %v33_v34 = vld [vmem:[%s521_s1 + $0x50] sm:$0xff]  ;;  %v34_v35 = vld [vmem:[%s521_s1 + $0x58] sm:$0xff]  ;;  %v52_v37 = vld [vmem:[%s521_s1 + $0xe8] sm:$0xff]  ;;  %285 = vmatprep.mubr.msk.f32.mxu1 %vm355_vm0, %v356_v57 }
   0xe   :  { %301 = vmatprep.subr.bf16.mxu0 %v300_v20  ;;  %v310_v38 = vpack.c.bf16 %v34_v35, %v33_v34  ;;  %v312_v39 = vpack.c.bf16 %v52_v37, %v51_v36  ;;  %v35_v40 = vld [vmem:[%s521_s1 + $0x60] sm:$0xff]  ;;  %v36_v41 = vld [vmem:[%s521_s1 + $0x68] sm:$0xff]  ;;  %v53_v42 = vld [vmem:[%s521_s1 + $0xf0] sm:$0xff] }
   0xf   :  { %v54_v43 = vld [vmem:[%s521_s1 + $0xf8] sm:$0xff]  ;;  %v314_v44 = vpack.c.bf16 %v36_v41, %v35_v40  ;;  %v37_v46 = vld [vmem:[%s521_s1 + $0x70] sm:$0xff]  ;;  %v21_v49 = vld [vmem:[%s520_s0] sm:$0xff] }
  0x10   :  { %v316_v45 = vpack.c.bf16 %v54_v43, %v53_v42  ;;  %v38_v47 = vld [vmem:[%s521_s1 + $0x78] sm:$0xff]  ;;  %v133_v50 = vld [vmem:[%s523_s3] sm:$0xff]  ;;  %v134_v51 = vld [vmem:[%s523_s3 + $0x8] sm:$0xff] }
  0x11   :  { %303 = vmatpush3.bf16.msra.mxu0 %v302_v26  ;;  %v318_v48 = vpack.c.bf16 %v38_v47, %v37_v46  ;;  %v321_v52 = vpack.c.bf16 %v134_v51, %v133_v50  ;;  %v135_v54 = vld [vmem:[%s523_s3 + $0x10] sm:$0xff]  ;;  %v136_v55 = vld [vmem:[%s523_s3 + $0x18] sm:$0xff]  ;;  %v234_v59 = vld [vmem:[%s522_s2] ss:$0 sm:$0xff]  ;;  %s357_s3 = smov [#allocation2]  }
  0x12   :  { %305 = vmatprep.subr.bf16.mxu0 %v304_v27  ;;  %v324_v56 = vpack.c.bf16 %v136_v55, %v135_v54  ;;  %v235_v0 = vld [vmem:[%s524_s4] ss:$0 sm:$0xff]  ;;  %s226_s21 = sshll.u32 %s357_s3, 4  ;;  %s227_s21 = int_to_ptr.vmem [resolvable:$true] %s226_s21 }
  0x13   :  { %322 = vmatpush3.bf16.msra.mxu1 %v321_v52  ;;  %s330_s22 = scalar_lea.vmem %s227_s21, 128  ;;  %p335_p1 = scmp.lt.s32.totalorder %s227_s21, %s227_s21 }
  0x14   :  { %323 = vmatprep.subr.bf16.mxu1 %v354_v53  ;;  %p331_p0 = scmp.ne.s32.totalorder %s227_s21, %s330_s22  ;;  %p336_p2 = scmp.lt.s32.totalorder %s330_s22, %s330_s22 }
  0x15   :  { %307 = vmatpush3.bf16.msra.mxu0 %v306_v32 }
  0x16   :  { %309 = vmatprep.subr.bf16.mxu0 %v308_v33  ;;  %p337_p3 = por %p336_p2, %p335_p1 }
  0x17   :  { %325 = vmatpush3.bf16.msra.mxu1 %v324_v56 }
  0x18   :  { %p338_p4 = pnand %p337_p3, %p331_p0 }
  0x19   :  { %311 = vmatpush3.bf16.msra.mxu0 %v310_v38 }
  0x1a   :  { %313 = vmatprep.subr.bf16.mxu0 %v312_v39 }
  0x1d   :  { %315 = vmatpush3.bf16.msra.mxu0 %v314_v44 }
  0x1e   :  { %317 = vmatprep.subr.bf16.mxu0 %v316_v45 }
  0x21   :  { %319 = vmatpush3.bf16.msra.mxu0 %v318_v48 }
  0x24   :  { %127 = vmatmul.mubr.f32.vlgmr.msra.gmra.mrb[0].mxu0 %v21_v49 }
  0xf7   :  { %v269_v58 = vpop.f32.mrb[0].mxu0 }
  0xf8   :  { %v270_v60 = vpop.f32.mrb[1].mxu0 }
  0xf9   :  { %v271_v61 = vadd.f32 %v270_v60, %v269_v58 }
  0xfb   :  { %v129_v62 = vadd.f32 %v271_v61, %v234_v59 }
  0xfd   :  { %v132_v63 = vmax.f32 %v129_v62, 0.0 }
  0xff   :  { %286 = vmatmul.mubr.msk.f32.vlgmr.msra.gmra.mrb[0].mxu1 %vm144_vm1, %v132_v63 }
 0x1d2   :  { %v214_v1 = vpop.f32.mrb[0].mxu1 }
 0x1d3   :  { %v215_v2 = vadd.f32 %v235_v0, %v214_v1  ;;  %v287_v3 = vpop.f32.mrb[1].mxu1 }
 0x1d5   :  { %219 = vst.msk [vmem:[#allocation2] sm:$0xff] %vm218_vm2, %v215_v2 }
 0x1d6   :  { %341 = shalt.err (!%p338_p4)
}
 0x1d7   :  { %s342_s24 = scalar_lea.hbm %s525_s5, 128 }
 0x1d8   :  { %p343_p5 = scmp.ne.s32.totalorder %s525_s5, %s342_s24  ;;  %p346_p6 = scmp.lt.u32.totalorder %s342_s24, %s525_s5 }
 0x1da   :  { %p348_p7 = pnand %p346_p6, %p343_p5 }
 0x1dc   :  { %351 = shalt.err (!%p348_p7)
}
 0x1dd   :  { %229 = dma.vmem_to_hbm [thread:$0]  %s227_s21, 128, %s525_s5, [#allocation3]  }
 0x1de   :  { %352 = dma.done.wait [#allocation3], 128  }
 0x1df   :  { %353 = vsyncadd [#allocation3], 4294967168 }
 0x1e0   :  { %233 = vsyncpa [#allocation3], 1 }

</bundles_post_ra>
